<compile_context>
chip_gen: v7x
topology: tpu7x:2x2x1
jax: 0.10.0
libtpu: 0.0.40
codegen_flags: <defaults>
</compile_context>

<pallas_src>
import jax
import jax.numpy as jnp
from jax.experimental import pallas as pl
from jax.experimental.pallas import tpu as pltpu


def _round_up(x, m):
    return ((x + m - 1) // m) * m


def _make_kernel(tb, tile_p, chunk):
    """Build the kernel for a (TB, C_in, tile_p) input block.

    The pixel tile is processed in static `chunk`-lane sub-chunks so the
    (32, chunk) f32 intermediates stay in vregs rather than round-tripping
    through VMEM.
    """
    chunks = [(c0, min(c0 + chunk, tile_p)) for c0 in range(0, tile_p, chunk)]

    def kernel(x_ref, w1_ref, b1_ref, w2_ref, b2_ref,
               wc_ref, bc_ref, wr_ref, br_ref, cls_ref, reg_ref):
        # Tiny weight/bias operands: load once per grid step (their constant
        # index_map means they are not re-DMA'd across steps).
        w1 = w1_ref[...]
        b1 = b1_ref[...]
        w2 = w2_ref[...]
        b2 = b2_ref[...]
        wc = wc_ref[...]
        bc = bc_ref[...]
        wr = wr_ref[...]
        br = br_ref[...]

        for b in range(tb):                      # static batch-in-step loop
            for c0, c1 in chunks:                # static pixel sub-chunks
                x = x_ref[b, :, c0:c1]           # (C_in, cw) lane-dense slab
                # base conv1 (1x1): f32 accumulate, +bias, ReLU
                h = jnp.dot(w1, x, preferred_element_type=jnp.float32) + b1
                h = jnp.maximum(h, 0.0)
                # base conv2 (1x1)
                h = jnp.dot(w2, h.astype(w2.dtype),
                            preferred_element_type=jnp.float32) + b2
                h = jnp.maximum(h, 0.0)
                hc = h.astype(wc.dtype)
                # two header convs -> two lane-dense output streams
                cls_ref[b, :, c0:c1] = (
                    jnp.dot(wc, hc, preferred_element_type=jnp.float32) + bc
                ).astype(cls_ref.dtype)
                reg_ref[b, :, c0:c1] = (
                    jnp.dot(wr, hc, preferred_element_type=jnp.float32) + br
                ).astype(reg_ref.dtype)

    return kernel


def predictor_forward(x_nchw, params, *, compute_dtype=jnp.float32,
                      out_dtype=jnp.float32, lane_cap=16384, chunk=512):
    """x_nchw: (N, C_in, H, W) float32.

    params: ((w1,b1),(w2,b2),(wc,bc),(wr,br)) with PyTorch-style 1x1 conv
    weights w: (C_out, C_in) (trailing 1x1 spatial dims squeezed), b: (C_out,).

    compute_dtype: dtype of x / weights inside the kernel (bf16 recommended on
    v5e); accumulation stays f32.  out_dtype: dtype of the kernel outputs.

    Returns [cls, reg] with the same .squeeze() semantics as the PyTorch module.
    """
    (w1, b1), (w2, b2), (wc, bc), (wr, br) = params
    N, C_in, H, W = x_nchw.shape
    HW = H * W
    C1, C2 = w1.shape[0], w2.shape[0]
    C_cls, C_reg = wc.shape[0], wr.shape[0]

    # Pixel tile: lane-dense (multiple of 128), capped by the per-step lane
    # budget.  If HW is small, pack several batch elements into one step so
    # the ~0.35 us per-grid-step overhead is amortized.
    lane_cap = max(128, _round_up(lane_cap, 128))
    tile_p = min(_round_up(HW, 128), lane_cap)
    tb = max(1, min(N, lane_cap // tile_p, 32))
    chunk = min(_round_up(chunk, 128), tile_p)

    # NCHW is already channels-first: flatten the spatial dims only (no
    # transpose, no pad — ragged pixel / batch edges are handled by Pallas).
    x3d = x_nchw.reshape(N, C_in, HW).astype(compute_dtype)

    w1c = w1.astype(compute_dtype)
    w2c = w2.astype(compute_dtype)
    wcc = wc.astype(compute_dtype)
    wrc = wr.astype(compute_dtype)
    # Biases stay f32 (added to the f32 accumulator); shaped (C, 1) so they
    # broadcast along the lane (pixel) axis.
    b1c = b1.reshape(C1, 1).astype(jnp.float32)
    b2c = b2.reshape(C2, 1).astype(jnp.float32)
    bcc = bc.reshape(C_cls, 1).astype(jnp.float32)
    brc = br.reshape(C_reg, 1).astype(jnp.float32)

    # Pixel-tile axis first (the larger one at scale) so v7x megacore shards it.
    grid = (pl.cdiv(HW, tile_p), pl.cdiv(N, tb))

    full2d = lambda shape: pl.BlockSpec(shape, lambda p, n: (0, 0))
    kernel = _make_kernel(tb, tile_p, chunk)

    cls3, reg3 = pl.pallas_call(
        kernel,
        out_shape=(jax.ShapeDtypeStruct((N, C_cls, HW), out_dtype),
                   jax.ShapeDtypeStruct((N, C_reg, HW), out_dtype)),
        grid_spec=pltpu.PrefetchScalarGridSpec(
            num_scalar_prefetch=0,
            grid=grid,
            in_specs=[
                # x tile: (tb, C_in, tile_p) channels-first, lane-dense pixels.
                pl.BlockSpec((tb, C_in, tile_p), lambda p, n: (n, 0, p)),
                full2d((C1, C_in)), full2d((C1, 1)),       # base conv1
                full2d((C2, C1)), full2d((C2, 1)),         # base conv2
                full2d((C_cls, C2)), full2d((C_cls, 1)),   # cls header
                full2d((C_reg, C2)), full2d((C_reg, 1)),   # reg header
            ],
            out_specs=[
                pl.BlockSpec((tb, C_cls, tile_p), lambda p, n: (n, 0, p)),
                pl.BlockSpec((tb, C_reg, tile_p), lambda p, n: (n, 0, p)),
            ],
        ),
        compiler_params=pltpu.CompilerParams(
            # Both grid axes are independent -> megacore/2-TC friendly (v7x).
            dimension_semantics=("parallel", "parallel"),
            # Explicit scoped-VMEM budget with headroom on all generations
            # (v7x has only 64 MiB physical per TC).
            vmem_limit_bytes=32 * 1024 * 1024,
        ),
    )(x3d, w1c, b1c, w2c, b2c, wcc, bcc, wrc, brc)

    # Contiguous reshape only (no slice / split copies), then .squeeze() to
    # match the PyTorch forward.
    cls = cls3.reshape(N, C_cls, H, W)
    reg = reg3.reshape(N, C_reg, H, W)
    return [jnp.squeeze(cls), jnp.squeeze(reg)]


def _reference_forward(x_nchw, params, compute_dtype=jnp.float32):
    """Pure-JAX reference with the same dtype-cast semantics (no Pallas)."""
    (w1, b1), (w2, b2), (wc, bc), (wr, br) = params
    N, C, H, W = x_nchw.shape
    x = x_nchw.reshape(N, C, H * W)

    def conv1x1(w, b, t):
        y = jnp.einsum('oi,nip->nop', w.astype(compute_dtype),
                       t.astype(compute_dtype),
                       preferred_element_type=jnp.float32)
        return y + b[None, :, None].astype(jnp.float32)

    h = jnp.maximum(conv1x1(w1, b1, x), 0.0)
    h = jnp.maximum(conv1x1(w2, b2, h), 0.0)
    cls = conv1x1(wc, bc, h).reshape(N, -1, H, W)
    reg = conv1x1(wr, br, h).reshape(N, -1, H, W)
    return [jnp.squeeze(cls), jnp.squeeze(reg)]


def _init_params(key, c_in=4, c_hidden=(32, 32), c_cls=3, c_reg=4):
    """Deterministic synthetic parameters, PyTorch Conv2d(k=1) layout:
    weight (C_out, C_in) (trailing 1x1 spatial dims squeezed), bias (C_out,)."""
    keys = jax.random.split(key, 8)

    def wb(kw, kb, cin, cout):
        w = jax.random.normal(kw, (cout, cin), jnp.float32) * 0.1
        b = jax.random.normal(kb, (cout,), jnp.float32) * 0.1
        return w, b

    p1 = wb(keys[0], keys[1], c_in, c_hidden[0])
    p2 = wb(keys[2], keys[3], c_hidden[0], c_hidden[1])
    pc = wb(keys[4], keys[5], c_hidden[1], c_cls)
    pr = wb(keys[6], keys[7], c_hidden[1], c_reg)
    return p1, p2, pc, pr


if __name__ == "__main__":
    key = jax.random.PRNGKey(0)
    k_x, k_p = jax.random.split(key)

    # x: (N, C_in, H, W) = (2, 4, 16, 16), matching PyTorch NCHW conv input.
    x = jax.random.normal(k_x, (2, 4, 16, 16), jnp.float32)
    params = _init_params(k_p)

    refs = _reference_forward(x, params, compute_dtype=jnp.float32)

    # f32 path, default knobs (batch packed into one grid step): exact parity.
    outs = predictor_forward(x, params, compute_dtype=jnp.float32)
    outs = [jax.block_until_ready(o) for o in outs]
    for o, r in zip(outs, refs):
        assert o.shape == r.shape, (o.shape, r.shape)
        assert jnp.allclose(o, r, rtol=1e-4, atol=1e-4), "f32 mismatch vs reference"

    # Same math with small knobs: exercises the multi-step grid (pixel+batch
    # axes) and the in-kernel multi-chunk loop.
    outs_small = predictor_forward(x, params, compute_dtype=jnp.float32,
                                   lane_cap=256, chunk=128)
    outs_small = [jax.block_until_ready(o) for o in outs_small]
    for o, r in zip(outs_small, refs):
        assert o.shape == r.shape, (o.shape, r.shape)
        assert jnp.allclose(o, r, rtol=1e-4, atol=1e-4), "small-tile mismatch"

    # bf16 path: reduced-precision inputs/weights, f32 accumulation (perf mode
    # for v5e's lower HBM bandwidth).
    outs_bf = predictor_forward(x, params, compute_dtype=jnp.bfloat16)
    outs_bf = [jax.block_until_ready(o) for o in outs_bf]
    refs_bf = _reference_forward(x, params, compute_dtype=jnp.bfloat16)
    for o, r in zip(outs_bf, refs_bf):
        assert o.shape == r.shape, (o.shape, r.shape)
        assert jnp.allclose(o, r, rtol=1e-2, atol=1e-2), "bf16 mismatch vs reference"

    print("KERNEL_OK")
</pallas_src>

<mosaic_0001>
module attributes {stable_mosaic.version = 11 : i64} {
  func.func @kernel(%arg0: i32, %arg1: i32, %arg2: memref<2x4x256xf32, #tpu.memory_space<vmem>>, %arg3: memref<32x4xf32, #tpu.memory_space<vmem>>, %arg4: memref<32x1xf32, #tpu.memory_space<vmem>>, %arg5: memref<32x32xf32, #tpu.memory_space<vmem>>, %arg6: memref<32x1xf32, #tpu.memory_space<vmem>>, %arg7: memref<3x32xf32, #tpu.memory_space<vmem>>, %arg8: memref<3x1xf32, #tpu.memory_space<vmem>>, %arg9: memref<4x32xf32, #tpu.memory_space<vmem>>, %arg10: memref<4x1xf32, #tpu.memory_space<vmem>>, %arg11: memref<2x3x256xf32, #tpu.memory_space<vmem>>, %arg12: memref<2x4x256xf32, #tpu.memory_space<vmem>>) attributes {dimension_semantics = [#tpu.dimension_semantics<parallel>, #tpu.dimension_semantics<parallel>], iteration_bounds = array<i64: 1, 1>, scalar_prefetch = 0 : i64, scratch_operands = 0 : i64, tpu.core_type = #tpu.core_type<tc>, window_params = [{transform_indices = @transform_0, window_bounds = array<i64: 2, 4, 256>}, {pipeline_mode = #tpu.pipeline_mode<synchronous>, transform_indices = @transform_1, window_bounds = array<i64: 32, 4>}, {pipeline_mode = #tpu.pipeline_mode<synchronous>, transform_indices = @transform_2, window_bounds = array<i64: 32, 1>}, {pipeline_mode = #tpu.pipeline_mode<synchronous>, transform_indices = @transform_3, window_bounds = array<i64: 32, 32>}, {pipeline_mode = #tpu.pipeline_mode<synchronous>, transform_indices = @transform_4, window_bounds = array<i64: 32, 1>}, {pipeline_mode = #tpu.pipeline_mode<synchronous>, transform_indices = @transform_5, window_bounds = array<i64: 3, 32>}, {pipeline_mode = #tpu.pipeline_mode<synchronous>, transform_indices = @transform_6, window_bounds = array<i64: 3, 1>}, {pipeline_mode = #tpu.pipeline_mode<synchronous>, transform_indices = @transform_7, window_bounds = array<i64: 4, 32>}, {pipeline_mode = #tpu.pipeline_mode<synchronous>, transform_indices = @transform_8, window_bounds = array<i64: 4, 1>}, {transform_indices = @transform_9, window_bounds = array<i64: 2, 3, 256>}, {transform_indices = @transform_10, window_bounds = array<i64: 2, 4, 256>}]} {
    %c0 = arith.constant 0 : index
    %c0_0 = arith.constant 0 : index
    %0 = vector.load %arg3[%c0, %c0_0] : memref<32x4xf32, #tpu.memory_space<vmem>>, vector<32x4xf32>
    %c0_1 = arith.constant 0 : index
    %c0_2 = arith.constant 0 : index
    %1 = vector.load %arg4[%c0_1, %c0_2] : memref<32x1xf32, #tpu.memory_space<vmem>>, vector<32x1xf32>
    %c0_3 = arith.constant 0 : index
    %c0_4 = arith.constant 0 : index
    %2 = vector.load %arg5[%c0_3, %c0_4] : memref<32x32xf32, #tpu.memory_space<vmem>>, vector<32x32xf32>
    %c0_5 = arith.constant 0 : index
    %c0_6 = arith.constant 0 : index
    %3 = vector.load %arg6[%c0_5, %c0_6] : memref<32x1xf32, #tpu.memory_space<vmem>>, vector<32x1xf32>
    %c0_7 = arith.constant 0 : index
    %c0_8 = arith.constant 0 : index
    %4 = vector.load %arg7[%c0_7, %c0_8] : memref<3x32xf32, #tpu.memory_space<vmem>>, vector<3x32xf32>
    %c0_9 = arith.constant 0 : index
    %c0_10 = arith.constant 0 : index
    %5 = vector.load %arg8[%c0_9, %c0_10] : memref<3x1xf32, #tpu.memory_space<vmem>>, vector<3x1xf32>
    %c0_11 = arith.constant 0 : index
    %c0_12 = arith.constant 0 : index
    %6 = vector.load %arg9[%c0_11, %c0_12] : memref<4x32xf32, #tpu.memory_space<vmem>>, vector<4x32xf32>
    %c0_13 = arith.constant 0 : index
    %c0_14 = arith.constant 0 : index
    %7 = vector.load %arg10[%c0_13, %c0_14] : memref<4x1xf32, #tpu.memory_space<vmem>>, vector<4x1xf32>
    %c0_15 = arith.constant 0 : index
    %c0_16 = arith.constant 0 : index
    %c0_17 = arith.constant 0 : index
    %8 = vector.load %arg2[%c0_15, %c0_16, %c0_17] : memref<2x4x256xf32, #tpu.memory_space<vmem>>, vector<1x4x256xf32>
    %9 = vector.shape_cast %8 : vector<1x4x256xf32> to vector<4x256xf32>
    %cst = arith.constant dense<0.000000e+00> : vector<32x256xf32>
    %10 = tpu.matmul %0, %9, %cst {dimension_numbers = #tpu.dot_dimension_numbers<[1], [0], [0], [1], [0, 0, 1, 1], [], []>} : vector<32x4xf32>, vector<4x256xf32>, vector<32x256xf32> -> vector<32x256xf32>
    %11 = vector.broadcast %1 : vector<32x1xf32> to vector<32x256xf32>
    %12 = arith.addf %10, %11 : vector<32x256xf32>
    %cst_18 = arith.constant 0.000000e+00 : f32
    %13 = vector.broadcast %cst_18 : f32 to vector<32x256xf32>
    %14 = arith.maximumf %12, %13 : vector<32x256xf32>
    %cst_19 = arith.constant dense<0.000000e+00> : vector<32x256xf32>
    %15 = tpu.matmul %2, %14, %cst_19 {dimension_numbers = #tpu.dot_dimension_numbers<[1], [0], [0], [1], [0, 0, 1, 1], [], []>} : vector<32x32xf32>, vector<32x256xf32>, vector<32x256xf32> -> vector<32x256xf32>
    %16 = vector.broadcast %3 : vector<32x1xf32> to vector<32x256xf32>
    %17 = arith.addf %15, %16 : vector<32x256xf32>
    %cst_20 = arith.constant 0.000000e+00 : f32
    %18 = vector.broadcast %cst_20 : f32 to vector<32x256xf32>
    %19 = arith.maximumf %17, %18 : vector<32x256xf32>
    %cst_21 = arith.constant dense<0.000000e+00> : vector<3x256xf32>
    %20 = tpu.matmul %4, %19, %cst_21 {dimension_numbers = #tpu.dot_dimension_numbers<[1], [0], [0], [1], [0, 0, 1, 1], [], []>} : vector<3x32xf32>, vector<32x256xf32>, vector<3x256xf32> -> vector<3x256xf32>
    %21 = vector.broadcast %5 : vector<3x1xf32> to vector<3x256xf32>
    %22 = arith.addf %20, %21 : vector<3x256xf32>
    %c0_22 = arith.constant 0 : index
    %c0_23 = arith.constant 0 : index
    %c0_24 = arith.constant 0 : index
    %23 = vector.load %arg11[%c0_22, %c0_23, %c0_24] : memref<2x3x256xf32, #tpu.memory_space<vmem>>, vector<1x3x256xf32>
    %24 = vector.shape_cast %23 : vector<1x3x256xf32> to vector<3x256xf32>
    %25 = vector.shape_cast %22 : vector<3x256xf32> to vector<1x3x256xf32>
    tpu.vector_store %arg11[%c0_22, %c0_23, %c0_24], %25 {strides = array<i32>} : memref<2x3x256xf32, #tpu.memory_space<vmem>>, vector<1x3x256xf32>,
    %cst_25 = arith.constant dense<0.000000e+00> : vector<4x256xf32>
    %26 = tpu.matmul %6, %19, %cst_25 {dimension_numbers = #tpu.dot_dimension_numbers<[1], [0], [0], [1], [0, 0, 1, 1], [], []>} : vector<4x32xf32>, vector<32x256xf32>, vector<4x256xf32> -> vector<4x256xf32>
    %27 = vector.broadcast %7 : vector<4x1xf32> to vector<4x256xf32>
    %28 = arith.addf %26, %27 : vector<4x256xf32>
    %c0_26 = arith.constant 0 : index
    %c0_27 = arith.constant 0 : index
    %c0_28 = arith.constant 0 : index
    %29 = vector.load %arg12[%c0_26, %c0_27, %c0_28] : memref<2x4x256xf32, #tpu.memory_space<vmem>>, vector<1x4x256xf32>
    %30 = vector.shape_cast %29 : vector<1x4x256xf32> to vector<4x256xf32>
    %31 = vector.shape_cast %28 : vector<4x256xf32> to vector<1x4x256xf32>
    tpu.vector_store %arg12[%c0_26, %c0_27, %c0_28], %31 {strides = array<i32>} : memref<2x4x256xf32, #tpu.memory_space<vmem>>, vector<1x4x256xf32>,
    %c1 = arith.constant 1 : index
    %c0_29 = arith.constant 0 : index
    %c0_30 = arith.constant 0 : index
    %32 = vector.load %arg2[%c1, %c0_29, %c0_30] : memref<2x4x256xf32, #tpu.memory_space<vmem>>, vector<1x4x256xf32>
    %33 = vector.shape_cast %32 : vector<1x4x256xf32> to vector<4x256xf32>
    %cst_31 = arith.constant dense<0.000000e+00> : vector<32x256xf32>
    %34 = tpu.matmul %0, %33, %cst_31 {dimension_numbers = #tpu.dot_dimension_numbers<[1], [0], [0], [1], [0, 0, 1, 1], [], []>} : vector<32x4xf32>, vector<4x256xf32>, vector<32x256xf32> -> vector<32x256xf32>
    %35 = vector.broadcast %1 : vector<32x1xf32> to vector<32x256xf32>
    %36 = arith.addf %34, %35 : vector<32x256xf32>
    %cst_32 = arith.constant 0.000000e+00 : f32
    %37 = vector.broadcast %cst_32 : f32 to vector<32x256xf32>
    %38 = arith.maximumf %36, %37 : vector<32x256xf32>
    %cst_33 = arith.constant dense<0.000000e+00> : vector<32x256xf32>
    %39 = tpu.matmul %2, %38, %cst_33 {dimension_numbers = #tpu.dot_dimension_numbers<[1], [0], [0], [1], [0, 0, 1, 1], [], []>} : vector<32x32xf32>, vector<32x256xf32>, vector<32x256xf32> -> vector<32x256xf32>
    %40 = vector.broadcast %3 : vector<32x1xf32> to vector<32x256xf32>
    %41 = arith.addf %39, %40 : vector<32x256xf32>
    %cst_34 = arith.constant 0.000000e+00 : f32
    %42 = vector.broadcast %cst_34 : f32 to vector<32x256xf32>
    %43 = arith.maximumf %41, %42 : vector<32x256xf32>
    %cst_35 = arith.constant dense<0.000000e+00> : vector<3x256xf32>
    %44 = tpu.matmul %4, %43, %cst_35 {dimension_numbers = #tpu.dot_dimension_numbers<[1], [0], [0], [1], [0, 0, 1, 1], [], []>} : vector<3x32xf32>, vector<32x256xf32>, vector<3x256xf32> -> vector<3x256xf32>
    %45 = vector.broadcast %5 : vector<3x1xf32> to vector<3x256xf32>
    %46 = arith.addf %44, %45 : vector<3x256xf32>
    %c1_36 = arith.constant 1 : index
    %c0_37 = arith.constant 0 : index
    %c0_38 = arith.constant 0 : index
    %47 = vector.load %arg11[%c1_36, %c0_37, %c0_38] : memref<2x3x256xf32, #tpu.memory_space<vmem>>, vector<1x3x256xf32>
    %48 = vector.shape_cast %47 : vector<1x3x256xf32> to vector<3x256xf32>
    %49 = vector.shape_cast %46 : vector<3x256xf32> to vector<1x3x256xf32>
    tpu.vector_store %arg11[%c1_36, %c0_37, %c0_38], %49 {strides = array<i32>} : memref<2x3x256xf32, #tpu.memory_space<vmem>>, vector<1x3x256xf32>,
    %cst_39 = arith.constant dense<0.000000e+00> : vector<4x256xf32>
    %50 = tpu.matmul %6, %43, %cst_39 {dimension_numbers = #tpu.dot_dimension_numbers<[1], [0], [0], [1], [0, 0, 1, 1], [], []>} : vector<4x32xf32>, vector<32x256xf32>, vector<4x256xf32> -> vector<4x256xf32>
    %51 = vector.broadcast %7 : vector<4x1xf32> to vector<4x256xf32>
    %52 = arith.addf %50, %51 : vector<4x256xf32>
    %c1_40 = arith.constant 1 : index
    %c0_41 = arith.constant 0 : index
    %c0_42 = arith.constant 0 : index
    %53 = vector.load %arg12[%c1_40, %c0_41, %c0_42] : memref<2x4x256xf32, #tpu.memory_space<vmem>>, vector<1x4x256xf32>
    %54 = vector.shape_cast %53 : vector<1x4x256xf32> to vector<4x256xf32>
    %55 = vector.shape_cast %52 : vector<4x256xf32> to vector<1x4x256xf32>
    tpu.vector_store %arg12[%c1_40, %c0_41, %c0_42], %55 {strides = array<i32>} : memref<2x4x256xf32, #tpu.memory_space<vmem>>, vector<1x4x256xf32>,
    return
  }
  func.func @transform_0(%arg0: i32, %arg1: i32) -> (i32, i32, i32) {
    %c0_i32 = arith.constant 0 : i32
    %c0_i32_0 = arith.constant 0 : i32
    return %arg1, %c0_i32, %arg0 : i32, i32, i32
  }
  func.func @transform_1(%arg0: i32, %arg1: i32) -> (i32, i32) {
    %c0_i32 = arith.constant 0 : i32
    %c0_i32_0 = arith.constant 0 : i32
    %c0_i32_1 = arith.constant 0 : i32
    return %c0_i32, %c0_i32_0 : i32, i32
  }
  func.func @transform_2(%arg0: i32, %arg1: i32) -> (i32, i32) {
    %c0_i32 = arith.constant 0 : i32
    %c0_i32_0 = arith.constant 0 : i32
    %c0_i32_1 = arith.constant 0 : i32
    return %c0_i32, %c0_i32_0 : i32, i32
  }
  func.func @transform_3(%arg0: i32, %arg1: i32) -> (i32, i32) {
    %c0_i32 = arith.constant 0 : i32
    %c0_i32_0 = arith.constant 0 : i32
    %c0_i32_1 = arith.constant 0 : i32
    return %c0_i32, %c0_i32_0 : i32, i32
  }
  func.func @transform_4(%arg0: i32, %arg1: i32) -> (i32, i32) {
    %c0_i32 = arith.constant 0 : i32
    %c0_i32_0 = arith.constant 0 : i32
    %c0_i32_1 = arith.constant 0 : i32
    return %c0_i32, %c0_i32_0 : i32, i32
  }
  func.func @transform_5(%arg0: i32, %arg1: i32) -> (i32, i32) {
    %c0_i32 = arith.constant 0 : i32
    %c0_i32_0 = arith.constant 0 : i32
    %c0_i32_1 = arith.constant 0 : i32
    return %c0_i32, %c0_i32_0 : i32, i32
  }
  func.func @transform_6(%arg0: i32, %arg1: i32) -> (i32, i32) {
    %c0_i32 = arith.constant 0 : i32
    %c0_i32_0 = arith.constant 0 : i32
    %c0_i32_1 = arith.constant 0 : i32
    return %c0_i32, %c0_i32_0 : i32, i32
  }
  func.func @transform_7(%arg0: i32, %arg1: i32) -> (i32, i32) {
    %c0_i32 = arith.constant 0 : i32
    %c0_i32_0 = arith.constant 0 : i32
    %c0_i32_1 = arith.constant 0 : i32
    return %c0_i32, %c0_i32_0 : i32, i32
  }
  func.func @transform_8(%arg0: i32, %arg1: i32) -> (i32, i32) {
    %c0_i32 = arith.constant 0 : i32
    %c0_i32_0 = arith.constant 0 : i32
    %c0_i32_1 = arith.constant 0 : i32
    return %c0_i32, %c0_i32_0 : i32, i32
  }
  func.func @transform_9(%arg0: i32, %arg1: i32) -> (i32, i32, i32) {
    %c0_i32 = arith.constant 0 : i32
    %c0_i32_0 = arith.constant 0 : i32
    return %arg1, %c0_i32, %arg0 : i32, i32, i32
  }
  func.func @transform_10(%arg0: i32, %arg1: i32) -> (i32, i32, i32) {
    %c0_i32 = arith.constant 0 : i32
    %c0_i32_0 = arith.constant 0 : i32
    return %arg1, %c0_i32, %arg0 : i32, i32, i32
  }
}

</mosaic_0001>

<bundles_post_ra>
// kernel: tpu_custom_call.1
= control target key start
LH: loop header
LB: loop body
LE: loop exit
PB: predicated region body
PF: predicated region fallthrough
CT: control target
= control target key end

     0   :  { %vm91_vm0 = vcmask 1043456   ;;  %v974_v2 = vmov 0.0   ;;  %vm78_vm1 = vcmask 31744   ;;  %v975_v5 = vmov 0   ;;  %s1262_s0 = inlined_call_operand.vmem [shape: f32[2,4,256], index: 0, kind: input, shape index: {}]   ;;  %s1263_s1 = inlined_call_operand.vmem [shape: f32[32,4], index: 1, kind: input, shape index: {}]   ;;  %s1264_s2 = inlined_call_operand.vmem [shape: f32[32,1], index: 2, kind: input, shape index: {}]   ;;  %s1265_s3 = inlined_call_operand.vmem [shape: f32[32,32], index: 3, kind: input, shape index: {}]   ;;  %s1266_s4 = inlined_call_operand.vmem [shape: f32[32,1], index: 4, kind: input, shape index: {}]   ;;  %s1267_s5 = inlined_call_operand.vmem [shape: f32[3,32], index: 5, kind: input, shape index: {}]   ;;  %s1268_s6 = inlined_call_operand.vmem [shape: f32[3,1], index: 6, kind: input, shape index: {}]   ;;  %s1269_s7 = inlined_call_operand.vmem [shape: f32[4,32], index: 7, kind: input, shape index: {}]   ;;  %s1270_s8 = inlined_call_operand.vmem [shape: f32[4,1], index: 8, kind: input, shape index: {}]   ;;  %s1271_s9 = inlined_call_operand.vmem [shape: f32[2,3,256], index: 9, kind: output, shape index: {0}]   ;;  %s1272_s10 = inlined_call_operand.hbm [shape: f32[2,4,256], index: 10, kind: output, shape index: {1}]  }
   0x1   :  { %v55_v0 = vld [vmem:[%s1262_s0] sm:$0xff]  ;;  %160 = vmatprep.mubr.f32.mxu0 %v974_v2  ;;  %290 = vmatprep.mubr.f32.mxu1 %v974_v2  ;;  %v41_v6 = vld [vmem:[%s1264_s2 + $0x10] sm:$0xff]  ;;  %v40_v7 = vld [vmem:[%s1264_s2 + $0x8] sm:$0xff] }
   0x2   :  { %v77_v1 = vcombine.high %v55_v0, %v55_v0  ;;  %v39_v3 = vld [vmem:[%s1264_s2] sm:$0xff]  ;;  %946 = vset.pattern.permute.xlu0 %v975_v5  ;;  %947 = vset.pattern.permute.xlu1 %v975_v5  ;;  %v42_v8 = vld [vmem:[%s1264_s2 + $0x18] sm:$0xff] }
   0x3   :  { %v1045_v4 = vld [vmem:[%s1263_s1] sm:$0xff]  ;;  %58 = vperm.xlu0 %946, %v39_v3   ;;  %68 = vperm.xlu1 %947, %v41_v6  }
   0x4   :  { %867 = vmatprep.subr.msk.mxu0 %vm91_vm0, %v77_v1 }
   0x5   :  { %868 = vmatpush1.msk.msra.mxu0 %vm91_vm0, %v55_v0 }
   0x6   :  { %869 = vmatmul.mubr.msk.f32.vlgmr.msra.gmra.mrb[0].mxu0 %vm78_vm1, %v1045_v4 }
   0x7   :  { %16 = vsyncpa [#allocation3], 0  ;;  %166 = vmatprep.mubr.f32.mxu0 %v974_v2  ;;  %v1064_v9 = vld [vmem:[%s1263_s1 + $0x8] sm:$0xff]  ;;  %63 = vperm.xlu0 %946, %v40_v7   ;;  %v47_v10 = vld [vmem:[%s1266_s4] sm:$0xff]  ;;  %vm213_vm2 = vcmask 261120   ;;  %s976_s11 = smov [#allocation2]  }
   0x8   :  { %73 = vperm.xlu1 %947, %v42_v8   ;;  %v48_v11 = vld [vmem:[%s1266_s4 + $0x8] sm:$0xff]  ;;  %v1078_v12 = vld [vmem:[%s1263_s1 + $0x10] sm:$0xff]  ;;  %v50_v14 = vld [vmem:[%s1266_s4 + $0x18] sm:$0xff]  ;;  %s854_s12 = sshll.u32 %s976_s11, 4  ;;  %s855_s12 = int_to_ptr.vmem [resolvable:$true] %s854_s12 }
   0x9   :  { %v49_v13 = vld [vmem:[%s1266_s4 + $0x10] sm:$0xff]  ;;  %v1092_v15 = vld [vmem:[%s1263_s1 + $0x18] sm:$0xff]  ;;  %v54_v16 = vld [vmem:[%s1270_s8] sm:$0xf]  ;;  %s950_s13 = scalar_lea.vmem %s855_s12, 256  ;;  %p955_p1 = scmp.lt.s32.totalorder %s855_s12, %s855_s12 }
   0xa   :  { %870 = vmatmul.mubr.msk.f32.gmra.mrb[2].mxu0 %vm78_vm1, %v1064_v9  ;;  %v52_v17 = vld [vmem:[%s1268_s6] sm:$0x7]  ;;  %v1130_v51 = vld [vmem:[%s1265_s3 + $0x8] sm:$0xff]  ;;  %v1138_v52 = vld [vmem:[%s1265_s3 + $0x10] sm:$0xff]  ;;  %p951_p0 = scmp.ne.s32.totalorder %s855_s12, %s950_s13  ;;  %p956_p2 = scmp.lt.s32.totalorder %s950_s13, %s950_s13 }
   0xb   :  { %172 = vmatprep.mubr.f32.mxu0 %v974_v2  ;;  %195 = vperm.xlu0 %946, %v47_v10   ;;  %v1122_v50 = vld [vmem:[%s1265_s3] sm:$0xff]  ;;  %v1146_v53 = vld [vmem:[%s1265_s3 + $0x18] sm:$0xff] }
   0xc   :  { %200 = vperm.xlu1 %947, %v48_v11   ;;  %p957_p3 = por %p956_p2, %p955_p1 }
   0xe   :  { %871 = vmatmul.mubr.msk.f32.gmra.mrb[4].mxu0 %vm78_vm1, %v1078_v12  ;;  %p958_p4 = pnand %p957_p3, %p951_p0 }
   0xf   :  { %178 = vmatprep.mubr.f32.mxu0 %v974_v2  ;;  %205 = vperm.xlu0 %946, %v49_v13  }
  0x10   :  { %210 = vperm.xlu1 %947, %v50_v14  }
  0x12   :  { %872 = vmatmul.mubr.msk.f32.gmra.mrb[6].mxu0 %vm78_vm1, %v1092_v15 }
  0x13   :  { %395 = vmatprep.mubr.f32.mxu0 %v974_v2  ;;  %409 = vperm.xlu0 %946, %v54_v16  }
  0x14   :  { %325 = vperm.xlu1 %947, %v52_v17  }
  0x82   :  { %v1103_v18 = vpop.permute.xlu0 %58  ;;  %v1110_v27 = vpop.permute.xlu1 %68 }
  0x86   :  { %v1106_v22 = vpop.permute.xlu0 %63 }
  0x87   :  { %v1114_v38 = vpop.permute.xlu1 %73 }
  0x8a   :  { %v1151_v56 = vpop.permute.xlu0 %195 }
  0x8b   :  { %v1154_v58 = vpop.permute.xlu1 %200 }
  0x8e   :  { %v1159_v10 = vpop.permute.xlu0 %205 }
  0x8f   :  { %v1162_v14 = vpop.permute.xlu1 %210 }
  0xd9   :  { %v162_v19 = vpop.f32.mrb[0].mxu0 }
  0xda   :  { %v164_v20 = vpop.f32.mrb[1].mxu0  ;;  %v163_v21 = vadd.f32 %v162_v19, %v1103_v18 }
  0xdb   :  { %v165_v23 = vadd.f32 %v164_v20, %v1103_v18 }
  0xdc   :  { %v185_v29 = vmax.f32 %v163_v21, 0.0 }
  0xdd   :  { %v168_v24 = vpop.f32.mrb[2].mxu0  ;;  %v186_v31 = vmax.f32 %v165_v23, 0.0 }
  0xde   :  { %v169_v25 = vadd.f32 %v168_v24, %v1106_v22  ;;  %v170_v26 = vpop.f32.mrb[3].mxu0 }
  0xdf   :  { %v171_v28 = vadd.f32 %v170_v26, %v1106_v22 }
  0xe0   :  { %v187_v30 = vmax.f32 %v169_v25, 0.0  ;;  %v879_v25 = vld [vmem:[%s1262_s0 + $0x8] sm:$0xff] }
  0xe1   :  { %v188_v32 = vmax.f32 %v171_v28, 0.0  ;;  %v174_v33 = vpop.f32.mrb[4].mxu0 }
  0xe2   :  { %v176_v34 = vpop.f32.mrb[5].mxu0  ;;  %v895_v35 = vpack.c.bf16 %v187_v30, %v185_v29  ;;  %v175_v37 = vadd.f32 %v174_v33, %v1110_v27  ;;  %v1178_v33 = vld [vmem:[%s1269_s7] sm:$0xf] }
  0xe3   :  { %v893_v36 = vpack.c.bf16 %v188_v32, %v186_v31  ;;  %v177_v39 = vadd.f32 %v176_v34, %v1110_v27  ;;  %v494_v31 = vcombine.high %v879_v25, %v879_v25  ;;  %v1173_v32 = vld [vmem:[%s1267_s5] sm:$0x7]  ;;  %v1200_v34 = vpop.permute.xlu0 %409 }
  0xe4   :  { %v189_v44 = vmax.f32 %v175_v37, 0.0 }
  0xe5   :  { %v180_v40 = vpop.f32.mrb[6].mxu0  ;;  %894 = vmatprep.subr.bf16.mxu1 %v893_v36  ;;  %v190_v46 = vmax.f32 %v177_v39, 0.0 }
  0xe6   :  { %v181_v41 = vadd.f32 %v180_v40, %v1114_v38  ;;  %v182_v42 = vpop.f32.mrb[7].mxu0  ;;  %896 = vmatpush1.bf16.msra.mxu1 %v895_v35 }
  0xe7   :  { %v183_v43 = vadd.f32 %v182_v42, %v1114_v38 }
  0xe8   :  { %v191_v45 = vmax.f32 %v181_v41, 0.0 }
  0xe9   :  { %v192_v47 = vmax.f32 %v183_v43, 0.0 }
  0xea   :  { %v899_v48 = vpack.c.bf16 %v191_v45, %v189_v44 }
  0xeb   :  { %v897_v49 = vpack.c.bf16 %v192_v47, %v190_v46 }
  0xed   :  { %898 = vmatprep.subr.bf16.mxu1 %v897_v49 }
  0xee   :  { %900 = vmatpush1.bf16.msra.mxu1 %v899_v48 }
  0xf1   :  { %873 = vmatmul.mubr.msk.f32.vlgmr.msra.gmra.mrb[0].mxu1 %vm213_vm2, %v1122_v50 }
  0xf2   :  { %296 = vmatprep.mubr.f32.mxu1 %v974_v2 }
  0xf5   :  { %874 = vmatmul.mubr.msk.f32.gmra.mrb[2].mxu1 %vm213_vm2, %v1130_v51 }
  0xf6   :  { %302 = vmatprep.mubr.f32.mxu1 %v974_v2 }
  0xf9   :  { %875 = vmatmul.mubr.msk.f32.gmra.mrb[4].mxu1 %vm213_vm2, %v1138_v52 }
  0xfa   :  { %308 = vmatprep.mubr.f32.mxu1 %v974_v2 }
  0xfd   :  { %876 = vmatmul.mubr.msk.f32.gmra.mrb[6].mxu1 %vm213_vm2, %v1146_v53 }
  0xfe   :  { %479 = vmatprep.mubr.f32.mxu1 %v974_v2 }
 0x1c4   :  { %v292_v54 = vpop.f32.mrb[0].mxu1 }
 0x1c5   :  { %v294_v55 = vpop.f32.mrb[1].mxu1  ;;  %v293_v57 = vadd.f32 %v292_v54, %v1151_v56 }
 0x1c6   :  { %v295_v59 = vadd.f32 %v294_v55, %v1151_v56 }
 0x1c7   :  { %v315_v0 = vmax.f32 %v293_v57, 0.0 }
 0x1c8   :  { %v298_v60 = vpop.f32.mrb[2].mxu1  ;;  %v316_v3 = vmax.f32 %v295_v59, 0.0 }
 0x1c9   :  { %v299_v61 = vadd.f32 %v298_v60, %v1154_v58  ;;  %v300_v62 = vpop.f32.mrb[3].mxu1 }
 0x1ca   :  { %v301_v63 = vadd.f32 %v300_v62, %v1154_v58 }
 0x1cb   :  { %v317_v1 = vmax.f32 %v299_v61, 0.0 }
 0x1cc   :  { %v318_v5 = vmax.f32 %v301_v63, 0.0  ;;  %v304_v6 = vpop.f32.mrb[4].mxu1 }
 0x1cd   :  { %v903_v7 = vpack.c.bf16 %v317_v1, %v315_v0  ;;  %v306_v8 = vpop.f32.mrb[5].mxu1  ;;  %v305_v13 = vadd.f32 %v304_v6, %v1159_v10 }
 0x1ce   :  { %v901_v11 = vpack.c.bf16 %v318_v5, %v316_v3  ;;  %v307_v16 = vadd.f32 %v306_v8, %v1159_v10 }
 0x1cf   :  { %v319_v23 = vmax.f32 %v305_v13, 0.0 }
 0x1d0   :  { %v310_v17 = vpop.f32.mrb[6].mxu1  ;;  %902 = vmatprep.subr.bf16.mxu0 %v901_v11  ;;  %910 = vmatprep.subr.bf16.mxu1 %v901_v11  ;;  %v320_v26 = vmax.f32 %v307_v16, 0.0 }
 0x1d1   :  { %v311_v19 = vadd.f32 %v310_v17, %v1162_v14  ;;  %v312_v20 = vpop.f32.mrb[7].mxu1  ;;  %904 = vmatpush1.bf16.msra.mxu0 %v903_v7  ;;  %912 = vmatpush1.bf16.msra.mxu1 %v903_v7 }
 0x1d2   :  { %v313_v21 = vadd.f32 %v312_v20, %v1162_v14 }
 0x1d3   :  { %v321_v24 = vmax.f32 %v311_v19, 0.0 }
 0x1d4   :  { %v322_v28 = vmax.f32 %v313_v21, 0.0 }
 0x1d5   :  { %v907_v29 = vpack.c.bf16 %v321_v24, %v319_v23 }
 0x1d6   :  { %v905_v30 = vpack.c.bf16 %v322_v28, %v320_v26 }
 0x1d8   :  { %906 = vmatprep.subr.bf16.mxu0 %v905_v30  ;;  %914 = vmatprep.subr.bf16.mxu1 %v905_v30 }
 0x1d9   :  { %908 = vmatpush1.bf16.msra.mxu0 %v907_v29  ;;  %916 = vmatpush1.bf16.msra.mxu1 %v907_v29 }
 0x1da   :  { %880 = vmatprep.subr.msk.mxu0 %vm91_vm0, %v494_v31 }
 0x1dc   :  { %877 = vmatmul.mubr.msk.f32.vlgmr.msra.gmra.mrb[8].mxu0 %vm213_vm2, %v1173_v32  ;;  %878 = vmatmul.mubr.msk.f32.vlgmr.msra.gmra.mrb[8].mxu1 %vm213_vm2, %v1178_v33 }
 0x1dd   :  { %881 = vmatpush1.msk.msra.mxu0 %vm91_vm0, %v879_v25  ;;  %563 = vmatprep.mubr.f32.mxu0 %v974_v2 }
 0x1de   :  { %660 = vmatprep.mubr.f32.mxu1 %v974_v2 }
 0x1e0   :  { %882 = vmatmul.mubr.msk.f32.vlgmr.msra.gmra.mrb[10].mxu0 %vm78_vm1, %v1045_v4  ;;  %v1202_v4 = vpop.permute.xlu1 %325 }
 0x1e1   :  { %569 = vmatprep.mubr.f32.mxu0 %v974_v2 }
 0x1e4   :  { %883 = vmatmul.mubr.msk.f32.gmra.mrb[12].mxu0 %vm78_vm1, %v1064_v9 }
 0x1e5   :  { %575 = vmatprep.mubr.f32.mxu0 %v974_v2 }
 0x1e8   :  { %884 = vmatmul.mubr.msk.f32.gmra.mrb[14].mxu0 %vm78_vm1, %v1078_v12 }
 0x1e9   :  { %581 = vmatprep.mubr.f32.mxu0 %v974_v2 }
 0x1ec   :  { %885 = vmatmul.mubr.msk.f32.gmra.mrb[16].mxu0 %vm78_vm1, %v1092_v15 }
 0x1ed   :  { %757 = vmatprep.mubr.f32.mxu0 %v974_v2 }
 0x2af   :  { %v397_v35 = vpop.f32.mrb[8].mxu0  ;;  %v481_v36 = vpop.f32.mrb[8].mxu1 }
 0x2b0   :  { %v398_v9 = vadd.f32 %v397_v35, %v1202_v4  ;;  %v482_v37 = vadd.f32 %v481_v36, %v1200_v34  ;;  %v399_v39 = vpop.f32.mrb[9].mxu0  ;;  %v483_v40 = vpop.f32.mrb[9].mxu1 }
 0x2b1   :  { %v400_v12 = vadd.f32 %v399_v39, %v1202_v4  ;;  %v484_v41 = vadd.f32 %v483_v40, %v1200_v34 }
 0x2b3   :  { %v404_v42 = vcombine.low %v398_v9, %v400_v12  ;;  %v488_v15 = vcombine.low %v482_v37, %v484_v41  ;;  %v565_v43 = vpop.f32.mrb[10].mxu0 }
 0x2b4   :  { %v567_v44 = vpop.f32.mrb[11].mxu0  ;;  %v566_v45 = vadd.f32 %v565_v43, %v1103_v18 }
 0x2b5   :  { %406 = vst [vmem:[%s1271_s9] sm:$0x77] %v404_v42  ;;  %490 = vst [vmem:[#allocation2] sm:$0xff] %v488_v15  ;;  %v568_v46 = vadd.f32 %v567_v44, %v1103_v18 }
 0x2b6   :  { %v588_v55 = vmax.f32 %v566_v45, 0.0 }
 0x2b7   :  { %v571_v47 = vpop.f32.mrb[12].mxu0  ;;  %v589_v59 = vmax.f32 %v568_v46, 0.0 }
 0x2b8   :  { %v572_v48 = vadd.f32 %v571_v47, %v1106_v22  ;;  %v573_v49 = vpop.f32.mrb[13].mxu0 }
 0x2b9   :  { %v574_v54 = vadd.f32 %v573_v49, %v1106_v22 }
 0x2ba   :  { %v590_v57 = vmax.f32 %v572_v48, 0.0 }
 0x2bb   :  { %v591_v60 = vmax.f32 %v574_v54, 0.0  ;;  %v577_v61 = vpop.f32.mrb[14].mxu0 }
 0x2bc   :  { %v919_v62 = vpack.c.bf16 %v590_v57, %v588_v55  ;;  %v579_v63 = vpop.f32.mrb[15].mxu0  ;;  %v578_v1 = vadd.f32 %v577_v61, %v1110_v27 }
 0x2bd   :  { %v917_v0 = vpack.c.bf16 %v591_v60, %v589_v59  ;;  %v580_v3 = vadd.f32 %v579_v63, %v1110_v27 }
 0x2be   :  { %v592_v7 = vmax.f32 %v578_v1, 0.0 }
 0x2bf   :  { %v583_v5 = vpop.f32.mrb[16].mxu0  ;;  %918 = vmatprep.subr.bf16.mxu1 %v917_v0  ;;  %v593_v11 = vmax.f32 %v580_v3, 0.0 }
 0x2c0   :  { %v584_v18 = vadd.f32 %v583_v5, %v1114_v38  ;;  %v585_v6 = vpop.f32.mrb[17].mxu0  ;;  %920 = vmatpush1.bf16.msra.mxu1 %v919_v62 }
 0x2c1   :  { %v586_v22 = vadd.f32 %v585_v6, %v1114_v38 }
 0x2c2   :  { %v594_v8 = vmax.f32 %v584_v18, 0.0 }
 0x2c3   :  { %v595_v13 = vmax.f32 %v586_v22, 0.0 }
 0x2c4   :  { %v923_v16 = vpack.c.bf16 %v594_v8, %v592_v7 }
 0x2c5   :  { %v921_v17 = vpack.c.bf16 %v595_v13, %v593_v11 }
 0x2c7   :  { %922 = vmatprep.subr.bf16.mxu1 %v921_v17 }
 0x2c8   :  { %924 = vmatpush1.bf16.msra.mxu1 %v923_v16 }
 0x2cb   :  { %886 = vmatmul.mubr.msk.f32.vlgmr.msra.gmra.mrb[10].mxu1 %vm213_vm2, %v1122_v50 }
 0x2cc   :  { %666 = vmatprep.mubr.f32.mxu1 %v974_v2 }
 0x2cf   :  { %887 = vmatmul.mubr.msk.f32.gmra.mrb[12].mxu1 %vm213_vm2, %v1130_v51 }
 0x2d0   :  { %672 = vmatprep.mubr.f32.mxu1 %v974_v2 }
 0x2d3   :  { %888 = vmatmul.mubr.msk.f32.gmra.mrb[14].mxu1 %vm213_vm2, %v1138_v52 }
 0x2d4   :  { %678 = vmatprep.mubr.f32.mxu1 %v974_v2 }
 0x2d7   :  { %889 = vmatmul.mubr.msk.f32.gmra.mrb[16].mxu1 %vm213_vm2, %v1146_v53 }
 0x39e   :  { %v662_v27 = vpop.f32.mrb[10].mxu1 }
 0x39f   :  { %v664_v38 = vpop.f32.mrb[11].mxu1  ;;  %v663_v19 = vadd.f32 %v662_v27, %v1151_v56 }
 0x3a0   :  { %v665_v50 = vadd.f32 %v664_v38, %v1151_v56 }
 0x3a1   :  { %v685_v24 = vmax.f32 %v663_v19, 0.0 }
 0x3a2   :  { %v668_v20 = vpop.f32.mrb[12].mxu1  ;;  %v686_v52 = vmax.f32 %v665_v50, 0.0 }
 0x3a3   :  { %v669_v21 = vadd.f32 %v668_v20, %v1154_v58  ;;  %v670_v51 = vpop.f32.mrb[13].mxu1 }
 0x3a4   :  { %v671_v23 = vadd.f32 %v670_v51, %v1154_v58 }
 0x3a5   :  { %v687_v25 = vmax.f32 %v669_v21, 0.0 }
 0x3a6   :  { %v688_v26 = vmax.f32 %v671_v23, 0.0  ;;  %v674_v28 = vpop.f32.mrb[14].mxu1 }
 0x3a7   :  { %v927_v29 = vpack.c.bf16 %v687_v25, %v685_v24  ;;  %v676_v30 = vpop.f32.mrb[15].mxu1  ;;  %v675_v31 = vadd.f32 %v674_v28, %v1159_v10 }
 0x3a8   :  { %v925_v53 = vpack.c.bf16 %v688_v26, %v686_v52  ;;  %v677_v35 = vadd.f32 %v676_v30, %v1159_v10 }
 0x3a9   :  { %v689_v37 = vmax.f32 %v675_v31, 0.0 }
 0x3aa   :  { %v680_v36 = vpop.f32.mrb[16].mxu1  ;;  %926 = vmatprep.subr.bf16.mxu0 %v925_v53  ;;  %v690_v40 = vmax.f32 %v677_v35, 0.0 }
 0x3ab   :  { %v681_v56 = vadd.f32 %v680_v36, %v1162_v14  ;;  %v682_v9 = vpop.f32.mrb[17].mxu1  ;;  %928 = vmatpush1.bf16.msra.mxu0 %v927_v29 }
 0x3ac   :  { %v683_v58 = vadd.f32 %v682_v9, %v1162_v14 }
 0x3ad   :  { %v691_v39 = vmax.f32 %v681_v56, 0.0 }
 0x3ae   :  { %v692_v12 = vmax.f32 %v683_v58, 0.0 }
 0x3af   :  { %v931_v41 = vpack.c.bf16 %v691_v39, %v689_v37 }
 0x3b0   :  { %v929_v42 = vpack.c.bf16 %v692_v12, %v690_v40 }
 0x3b2   :  { %930 = vmatprep.subr.bf16.mxu0 %v929_v42 }
 0x3b3   :  { %932 = vmatpush1.bf16.msra.mxu0 %v931_v41 }
 0x3b4   :  { %934 = vmatprep.subr.bf16.mxu0 %v925_v53 }
 0x3b6   :  { %890 = vmatmul.mubr.msk.f32.vlgmr.msra.gmra.mrb[18].mxu0 %vm213_vm2, %v1173_v32 }
 0x3b7   :  { %936 = vmatpush1.bf16.msra.mxu0 %v927_v29  ;;  %834 = vmatprep.mubr.f32.mxu0 %v974_v2 }
 0x3b8   :  { %938 = vmatprep.subr.bf16.mxu0 %v929_v42 }
 0x3bb   :  { %940 = vmatpush1.bf16.msra.mxu0 %v931_v41 }
 0x3be   :  { %892 = vmatmul.mubr.msk.f32.vlgmr.msra.gmra.mrb[20].mxu0 %vm213_vm2, %v1178_v33 }
 0x489   :  { %v759_v10 = vpop.f32.mrb[18].mxu0 }
 0x48a   :  { %v760_v14 = vadd.f32 %v759_v10, %v1202_v4  ;;  %v761_v15 = vpop.f32.mrb[19].mxu0 }
 0x48b   :  { %v762_v43 = vadd.f32 %v761_v15, %v1202_v4 }
 0x48d   :  { %v766_v44 = vcombine.low %v760_v14, %v762_v43 }
 0x48f   :  { %891 = vst [vmem:[%s1271_s9 + $0x8] sm:$0x77] %v766_v44 }
 0x491   :  { %v836_v32 = vpop.f32.mrb[20].mxu0 }
 0x492   :  { %v837_v2 = vadd.f32 %v836_v32, %v1200_v34  ;;  %v838_v45 = vpop.f32.mrb[21].mxu0 }
 0x493   :  { %v839_v46 = vadd.f32 %v838_v45, %v1200_v34 }
 0x495   :  { %v843_v33 = vcombine.low %v837_v2, %v839_v46 }
 0x497   :  { %846 = vst [vmem:[#allocation2 + $0x8] sm:$0xff] %v843_v33 }
 0x498   :  { %961 = shalt.err (!%p958_p4)
}
 0x499   :  { %s962_s15 = scalar_lea.hbm %s1272_s10, 256 }
 0x49a   :  { %p963_p5 = scmp.ne.s32.totalorder %s1272_s10, %s962_s15  ;;  %p966_p6 = scmp.lt.u32.totalorder %s962_s15, %s1272_s10 }
 0x49c   :  { %p968_p7 = pnand %p966_p6, %p963_p5 }
 0x49e   :  { %971 = shalt.err (!%p968_p7)
}
 0x49f   :  { %s977_s20 = smov 128   ;;  %s978_s21 = smov 8  }
 0x4a0   :  { %860 = dma.vmem_to_hbm [thread:$0]  %s855_s12, 256, %s1272_s10, [#allocation3], %s977_s20, %s977_s20, %s978_s21  }
 0x4a1   :  { %972 = dma.done.wait [#allocation3], 256  }
 0x4a2   :  { %973 = vsyncadd [#allocation3], 4294967040 }
 0x4a3   :  { %866 = vsyncpa [#allocation3], 1 }

</bundles_post_ra>
